<compile_context>
chip_gen: v7x
topology: tpu7x:2x2x1
jax: 0.10.0
libtpu: 0.0.40
codegen_flags: <defaults>
</compile_context>

<pallas_src>
import functools

import jax
import jax.numpy as jnp
from jax.experimental import pallas as pl
from jax.experimental.pallas import tpu as pltpu


# --------------------------------------------------------------------------
# Fused Pallas kernel: out = [relu]( (A @ B) * scale + bias [+ residual] )
# A = im2col patches (M, K) bf16, B = pre-packed conv weights (K, N) bf16.
# Accumulation in f32 on the MXU; BN affine / residual / ReLU fused epilogue.
# Output stored in bf16 (next layer consumes bf16 anyway).
# --------------------------------------------------------------------------
def _mm_affine_kernel(a_ref, b_ref, s_ref, c_ref, *rest, relu, has_res):
    if has_res:
        r_ref, o_ref = rest
    else:
        (o_ref,) = rest
    acc = jnp.dot(a_ref[...], b_ref[...], preferred_element_type=jnp.float32)
    y = acc * s_ref[...] + c_ref[...]
    if has_res:
        y = y + r_ref[...].astype(jnp.float32)
    if relu:
        y = jnp.maximum(y, 0.0)
    o_ref[...] = y.astype(o_ref.dtype)


def _pick_tiles(M, N, K):
    """Full-K blocks, no M/N padding.  Keep the grid at (1,1) unless a block
    would exceed a per-buffer VMEM budget (splitting tiny matmuls is pure
    per-step overhead on single-TC v5e/v6e and gives v7x TCs almost no work
    at this problem size).  Splits preserve (8,128) divisibility."""
    budget = 8 << 20                                   # bytes per (bf16) block
    tn = N
    while tn > 128 and (tn // 2) % 128 == 0 and K * tn * 2 > budget:
        tn //= 2
    tm = M
    while tm > 256 and (tm // 2) % 8 == 0 and tm * max(K, tn) * 2 > budget:
        tm //= 2
    return tm, tn


def matmul_affine(a, b, scale, bias, residual=None, relu=True):
    """[relu]((a @ b) * scale + bias [+ residual]) as one Pallas call.

    a: (M, Ka) bf16 patches; b: (K, N) pre-packed bf16 weights (K may be padded
    vs Ka, e.g. stem 9 -> 16).  scale / bias: (N,) folded BN affine (f32).
    residual: optional (M, N) bf16.  Output: (M, N) bf16.
    """
    M, Ka = a.shape
    K, N = b.shape
    if a.dtype != jnp.bfloat16:
        a = a.astype(jnp.bfloat16)
    if Ka != K:                                        # only the stem (9 -> 16)
        a = jnp.pad(a, ((0, 0), (0, K - Ka)))
    s = scale.reshape(1, N).astype(jnp.float32)
    c = bias.reshape(1, N).astype(jnp.float32)

    tm, tn = _pick_tiles(M, N, K)
    grid = (M // tm, N // tn)

    args = [a, b, s, c]
    in_specs = [pl.BlockSpec((tm, K), lambda i, j: (i, 0)),
                pl.BlockSpec((K, tn), lambda i, j: (0, j)),
                pl.BlockSpec((1, tn), lambda i, j: (0, j)),
                pl.BlockSpec((1, tn), lambda i, j: (0, j))]
    res_bytes = 0
    if residual is not None:
        residual = residual.astype(jnp.bfloat16)
        args.append(residual)
        in_specs.append(pl.BlockSpec((tm, tn), lambda i, j: (i, j)))
        res_bytes = M * N * 2

    cost = pl.CostEstimate(
        flops=2 * M * N * K,
        transcendentals=0,
        bytes_accessed=M * K * 2 + K * N * 2 + M * N * 2 + 2 * N * 4 + res_bytes)

    kernel = functools.partial(_mm_affine_kernel, relu=relu,
                               has_res=residual is not None)
    return pl.pallas_call(
        kernel,
        out_shape=jax.ShapeDtypeStruct((M, N), jnp.bfloat16),
        grid=grid,
        in_specs=in_specs,
        out_specs=pl.BlockSpec((tm, tn), lambda i, j: (i, j)),
        compiler_params=pltpu.CompilerParams(
            dimension_semantics=("parallel", "parallel"),
            vmem_limit_bytes=32 * 1024 * 1024),
        cost_estimate=cost,
    )(*args)


# --------------------------------------------------------------------------
# im2col glue (pure JAX: padding / strided slicing / concat only; bf16 slabs)
# --------------------------------------------------------------------------
def _extract_patches(x, ksize, stride, pad, pad_value=0.0):
    """x: (N,H,W,C) -> ((N*Ho*Wo, ksize*ksize*C), Ho, Wo); window order (kh,kw,c)."""
    N, H, W, C = x.shape
    if pad > 0:
        x = jnp.pad(x, ((0, 0), (pad, pad), (pad, pad), (0, 0)),
                    constant_values=pad_value)
    Hp, Wp = H + 2 * pad, W + 2 * pad
    Ho = (Hp - ksize) // stride + 1
    Wo = (Wp - ksize) // stride + 1
    if ksize == 1 and pad == 0:
        patches = x[:, ::stride, ::stride, :]          # 1x1 conv: no concat needed
    else:
        pieces = [x[:, kh:kh + stride * Ho:stride, kw:kw + stride * Wo:stride, :]
                  for kh in range(ksize) for kw in range(ksize)]
        patches = jnp.concatenate(pieces, axis=-1)
    return patches.reshape(N * Ho * Wo, ksize * ksize * C), Ho, Wo


def conv_bn_act(x, w2d, scale, bias, ksize, stride=1, pad=1, residual=None, relu=True):
    """Fused conv + folded-BN affine [+ residual] [+ ReLU].

    x: (N,H,W,Cin) bf16 NHWC; w2d: pre-packed (kh*kw*Cin [padded], Cout) bf16.
    residual: optional (N,Ho,Wo,Cout) bf16.  Returns (N,Ho,Wo,Cout) bf16."""
    a, Ho, Wo = _extract_patches(x, ksize, stride, pad)
    Nb = x.shape[0]
    Cout = w2d.shape[1]
    r2d = None if residual is None else residual.reshape(Nb * Ho * Wo, Cout)
    y = matmul_affine(a, w2d, scale, bias, residual=r2d, relu=relu)
    return y.reshape(Nb, Ho, Wo, Cout)


# --------------------------------------------------------------------------
# MaxPool 3x3 stride 2 pad 1 — Pallas reduction over pre-grouped windows.
# The patch slab is re-laid-out so the kernel's output last dim is 128 lanes
# and the reduction is plain strided maxes (no in-kernel concatenate).
# --------------------------------------------------------------------------
def _maxpool_kernel(p_ref, o_ref, *, ntap, width):
    p = p_ref[...].astype(jnp.float32)                 # keep VPU math in f32
    m = p[:, 0:width]
    for t in range(1, ntap):
        m = jnp.maximum(m, p[:, t * width:(t + 1) * width])
    o_ref[...] = m.astype(o_ref.dtype)


def maxpool3x3s2(x):
    N, H, W, C = x.shape
    p, Ho, Wo = _extract_patches(x, 3, 2, 1, pad_value=-jnp.inf)   # (M, 9*C) bf16
    M = N * Ho * Wo
    # Group rows so the kernel's output last dim is >= 128 lanes (unmasked stores).
    g = 1
    if C < 128 and (128 % C) == 0 and M % (128 // C) == 0:
        g = 128 // C
    rows = M // g
    if g > 1:
        # (rows, g, 9, C) -> (rows, 9, g, C): same-tap channels for the g rows
        # become contiguous lanes; max is then a strided slice reduction.
        p = p.reshape(rows, g, 9, C).transpose(0, 2, 1, 3).reshape(rows, 9 * g * C)
    width = g * C
    # Row-tile the grid (keeps blocks VMEM-safe at realistic H, W).
    tr = rows
    while tr > 256 and tr % 2 == 0 and (tr // 2) % 8 == 0:
        tr //= 2
    kernel = functools.partial(_maxpool_kernel, ntap=9, width=width)
    out = pl.pallas_call(
        kernel,
        out_shape=jax.ShapeDtypeStruct((rows, width), jnp.bfloat16),
        grid=(rows // tr,),
        in_specs=[pl.BlockSpec((tr, 9 * width), lambda i: (i, 0))],
        out_specs=pl.BlockSpec((tr, width), lambda i: (i, 0)),
        compiler_params=pltpu.CompilerParams(
            dimension_semantics=("parallel",)),
    )(p)
    return out.reshape(N, Ho, Wo, C)


# --------------------------------------------------------------------------
# Global avg-pool + fc + bias, one tiny Pallas kernel.  Pooling matmul is
# applied BEFORE the fc (fewer FLOPs, lane-dense (N, 512) intermediate).
# --------------------------------------------------------------------------
def _avgpool_fc_kernel(p_ref, x_ref, w_ref, b_ref, o_ref):
    pooled = jnp.dot(p_ref[...], x_ref[...].astype(jnp.float32),
                     preferred_element_type=jnp.float32)           # (N, C)
    o_ref[...] = jnp.dot(pooled, w_ref[...].astype(jnp.float32),
                         preferred_element_type=jnp.float32) + b_ref[...]


def avgpool_fc(x, fc_wm, fc_b):
    """x: (N,H,W,C) bf16; fc_wm: (C, num_classes) bf16; fc_b: (num_classes,)."""
    N, H, W, C = x.shape
    hw = H * W
    nc = fc_wm.shape[1]
    x2d = x.reshape(N * hw, C)                                       # bf16
    pool = jnp.kron(jnp.eye(N, dtype=jnp.float32),
                    jnp.full((1, hw), 1.0 / hw, jnp.float32))        # (N, N*hw)
    b = fc_b.reshape(1, nc).astype(jnp.float32)
    return pl.pallas_call(
        _avgpool_fc_kernel,
        out_shape=jax.ShapeDtypeStruct((N, nc), jnp.float32),
        grid=(1,),
        in_specs=[pl.BlockSpec(pool.shape, lambda i: (0, 0)),
                  pl.BlockSpec(x2d.shape, lambda i: (0, 0)),
                  pl.BlockSpec(fc_wm.shape, lambda i: (0, 0)),
                  pl.BlockSpec(b.shape, lambda i: (0, 0))],
        out_specs=pl.BlockSpec((N, nc), lambda i: (0, 0)),
    )(pool, x2d, fc_wm, b)


# --------------------------------------------------------------------------
# Synthetic, deterministic parameters (shapes from torchvision resnet18),
# pre-packed for the kernels: conv weights as (K, Cout) bf16, BN folded f32.
# --------------------------------------------------------------------------
def _conv_init(key, cout, cin, k):
    fan_in = cin * k * k
    return jax.random.normal(key, (cout, cin, k, k), jnp.float32) * (2.0 / fan_in) ** 0.5


def _prep_conv_w(w):
    """(Cout,Cin,kh,kw) PyTorch layout -> (kh*kw*Cin [padded to x16], Cout) bf16."""
    cout, cin, kh, kw = w.shape
    K = kh * kw * cin
    wm = jnp.transpose(w, (2, 3, 1, 0)).reshape(K, cout)
    Kp = -(-K // 16) * 16
    if Kp != K:
        wm = jnp.pad(wm, ((0, Kp - K), (0, 0)))
    return wm.astype(jnp.bfloat16)


def _bn_init(key, c, eps=1e-5):
    k1, k2, k3, k4 = jax.random.split(key, 4)
    gamma = 1.0 + 0.1 * jax.random.normal(k1, (c,), jnp.float32)
    beta = 0.1 * jax.random.normal(k2, (c,), jnp.float32)
    mean = 0.1 * jax.random.normal(k3, (c,), jnp.float32)
    var = 1.0 + 0.1 * jnp.abs(jax.random.normal(k4, (c,), jnp.float32))
    scale = gamma / jnp.sqrt(var + eps)
    bias = beta - mean * scale
    return scale, bias


def _make_block(key, cin, cout, stride):
    keys = jax.random.split(key, 6)
    p = {
        'conv1_wm': _prep_conv_w(_conv_init(keys[0], cout, cin, 3)),
        'bn1': _bn_init(keys[1], cout),
        'conv2_wm': _prep_conv_w(_conv_init(keys[2], cout, cout, 3)),
        'bn2': _bn_init(keys[3], cout),
        'stride': stride,
    }
    if stride != 1 or cin != cout:
        p['ds_wm'] = _prep_conv_w(_conv_init(keys[4], cout, cin, 1))
        p['ds_bn'] = _bn_init(keys[5], cout)
    return p


def make_params(key, num_classes=2):
    keys = jax.random.split(key, 16)
    conv1_w = _conv_init(keys[0], 64, 1, 3)                # replaced conv1 (has bias)
    conv1_b = 0.1 * jax.random.normal(keys[1], (64,), jnp.float32)
    bn1_s, bn1_b = _bn_init(keys[2], 64)
    params = {
        'conv1_wm': _prep_conv_w(conv1_w),
        # conv1 bias folded into the BN affine at build time.
        'bn1': (bn1_s, bn1_b + bn1_s * conv1_b),
    }
    cfg = [(64, 64, 1), (64, 128, 2), (128, 256, 2), (256, 512, 2)]
    layers = []
    kidx = 3
    for cin, cout, stride in cfg:
        b0 = _make_block(keys[kidx], cin, cout, stride); kidx += 1
        b1 = _make_block(keys[kidx], cout, cout, 1); kidx += 1
        layers.append([b0, b1])
    params['layers'] = layers
    fc_w = jax.random.normal(keys[kidx], (num_classes, 512), jnp.float32) * (1.0 / 512) ** 0.5
    params['fc_wm'] = fc_w.T.astype(jnp.bfloat16)           # (512, num_classes)
    params['fc_b'] = 0.1 * jax.random.normal(keys[kidx + 1], (num_classes,), jnp.float32)
    return params


# --------------------------------------------------------------------------
# ResNet18 forward
# --------------------------------------------------------------------------
def basic_block(x, p):
    stride = p['stride']
    s1, b1 = p['bn1']
    s2, b2 = p['bn2']
    out = conv_bn_act(x, p['conv1_wm'], s1, b1, ksize=3, stride=stride, pad=1, relu=True)
    if 'ds_wm' in p:
        ds_s, ds_b = p['ds_bn']
        idt = conv_bn_act(x, p['ds_wm'], ds_s, ds_b, ksize=1, stride=stride, pad=0, relu=False)
    else:
        idt = x
    out = conv_bn_act(out, p['conv2_wm'], s2, b2, ksize=3, stride=1, pad=1,
                      residual=idt, relu=True)
    return out


def resnet18_forward(x_nchw, params):
    # Input follows PyTorch NCHW; kernels run channels-last in bf16 with f32
    # accumulation (elementwise epilogues stay f32 inside the kernels).
    x = jnp.transpose(x_nchw, (0, 2, 3, 1)).astype(jnp.bfloat16)      # -> NHWC
    # Stem: conv1 (+bias, folded) -> bn1 -> relu, fused in one kernel.
    s, b = params['bn1']
    out = conv_bn_act(x, params['conv1_wm'], s, b, ksize=3, stride=1, pad=1, relu=True)
    out = maxpool3x3s2(out)
    for layer in params['layers']:
        for block in layer:
            out = basic_block(out, block)
    return avgpool_fc(out, params['fc_wm'], params['fc_b'])           # (N, num_classes)


if __name__ == "__main__":
    key = jax.random.PRNGKey(0)
    pkey, xkey = jax.random.split(key)
    params = make_params(pkey, num_classes=2)
    x = jax.random.normal(xkey, (2, 1, 16, 16), jnp.float32)          # NCHW, 1 channel
    out = resnet18_forward(x, params)
    jax.block_until_ready(out)
    assert out.shape == (2, 2), out.shape
    assert bool(jnp.all(jnp.isfinite(out)))
    print("KERNEL_OK")
</pallas_src>

<mosaic_0001>
module attributes {stable_mosaic.version = 11 : i64} {
  func.func @_mm_affine_kernel(%arg0: i32, %arg1: i32, %arg2: memref<512x16xbf16, #tpu.memory_space<vmem>>, %arg3: memref<16x64xbf16, #tpu.memory_space<vmem>>, %arg4: memref<1x64xf32, #tpu.memory_space<vmem>>, %arg5: memref<1x64xf32, #tpu.memory_space<vmem>>, %arg6: memref<512x64xbf16, #tpu.memory_space<vmem>>) attributes {dimension_semantics = [#tpu.dimension_semantics<parallel>, #tpu.dimension_semantics<parallel>], iteration_bounds = array<i64: 1, 1>, scalar_prefetch = 0 : i64, scratch_operands = 0 : i64, tpu.core_type = #tpu.core_type<tc>, window_params = [{transform_indices = @transform_0, window_bounds = array<i64: 512, 16>}, {transform_indices = @transform_1, window_bounds = array<i64: 16, 64>}, {transform_indices = @transform_2, window_bounds = array<i64: 1, 64>}, {transform_indices = @transform_3, window_bounds = array<i64: 1, 64>}, {transform_indices = @transform_4, window_bounds = array<i64: 512, 64>}]} {
    %c0 = arith.constant 0 : index
    %c0_0 = arith.constant 0 : index
    %0 = vector.load %arg2[%c0, %c0_0] : memref<512x16xbf16, #tpu.memory_space<vmem>>, vector<512x16xbf16>
    %c0_1 = arith.constant 0 : index
    %c0_2 = arith.constant 0 : index
    %1 = vector.load %arg3[%c0_1, %c0_2] : memref<16x64xbf16, #tpu.memory_space<vmem>>, vector<16x64xbf16>
    %cst = arith.constant dense<0.000000e+00> : vector<512x64xf32>
    %2 = tpu.matmul %0, %1, %cst {dimension_numbers = #tpu.dot_dimension_numbers<[1], [0], [0], [1], [0, 0, 1, 1], [], []>} : vector<512x16xbf16>, vector<16x64xbf16>, vector<512x64xf32> -> vector<512x64xf32>
    %c0_3 = arith.constant 0 : index
    %c0_4 = arith.constant 0 : index
    %3 = vector.load %arg4[%c0_3, %c0_4] : memref<1x64xf32, #tpu.memory_space<vmem>>, vector<1x64xf32>
    %4 = vector.broadcast %3 : vector<1x64xf32> to vector<512x64xf32>
    %5 = arith.mulf %2, %4 : vector<512x64xf32>
    %c0_5 = arith.constant 0 : index
    %c0_6 = arith.constant 0 : index
    %6 = vector.load %arg5[%c0_5, %c0_6] : memref<1x64xf32, #tpu.memory_space<vmem>>, vector<1x64xf32>
    %7 = vector.broadcast %6 : vector<1x64xf32> to vector<512x64xf32>
    %8 = arith.addf %5, %7 : vector<512x64xf32>
    %cst_7 = arith.constant 0.000000e+00 : f32
    %9 = vector.broadcast %cst_7 : f32 to vector<512x64xf32>
    %10 = arith.maximumf %8, %9 : vector<512x64xf32>
    %11 = arith.truncf %10 : vector<512x64xf32> to vector<512x64xbf16>
    %c0_8 = arith.constant 0 : index
    %c0_9 = arith.constant 0 : index
    %12 = vector.load %arg6[%c0_8, %c0_9] : memref<512x64xbf16, #tpu.memory_space<vmem>>, vector<512x64xbf16>
    tpu.vector_store %arg6[%c0_8, %c0_9], %11 {strides = array<i32>} : memref<512x64xbf16, #tpu.memory_space<vmem>>, vector<512x64xbf16>,
    return
  }
  func.func @transform_0(%arg0: i32, %arg1: i32) -> (i32, i32) {
    %c0_i32 = arith.constant 0 : i32
    %c0_i32_0 = arith.constant 0 : i32
    return %arg0, %c0_i32 : i32, i32
  }
  func.func @transform_1(%arg0: i32, %arg1: i32) -> (i32, i32) {
    %c0_i32 = arith.constant 0 : i32
    %c0_i32_0 = arith.constant 0 : i32
    return %c0_i32, %arg1 : i32, i32
  }
  func.func @transform_2(%arg0: i32, %arg1: i32) -> (i32, i32) {
    %c0_i32 = arith.constant 0 : i32
    %c0_i32_0 = arith.constant 0 : i32
    return %c0_i32, %arg1 : i32, i32
  }
  func.func @transform_3(%arg0: i32, %arg1: i32) -> (i32, i32) {
    %c0_i32 = arith.constant 0 : i32
    %c0_i32_0 = arith.constant 0 : i32
    return %c0_i32, %arg1 : i32, i32
  }
  func.func @transform_4(%arg0: i32, %arg1: i32) -> (i32, i32) {
    %c0_i32 = arith.constant 0 : i32
    return %arg0, %arg1 : i32, i32
  }
}

</mosaic_0001>

<bundles_post_ra>
// kernel: tpu_custom_call.1
= control target key start
LH: loop header
LB: loop body
LE: loop exit
PB: predicated region body
PF: predicated region fallthrough
CT: control target
= control target key end

     0   :  { %vm250_vm0 = vcmask 130048   ;;  %vm1098_vm1 = vcmask 519168   ;;  %s2046_s1 = inlined_call_operand.vmem [shape: bf16[16,64], index: 1, kind: input, shape index: {}]   ;;  %s2047_s0 = inlined_call_operand.vmem [shape: bf16[512,16], index: 0, kind: input, shape index: {}]   ;;  %s2048_s2 = inlined_call_operand.vmem [shape: f32[1,64], index: 2, kind: input, shape index: {}]   ;;  %s2049_s3 = inlined_call_operand.vmem [shape: f32[1,64], index: 3, kind: input, shape index: {}]   ;;  %s2050_s4 = inlined_call_operand.vmem [shape: bf16[512,64], index: 4, kind: output, shape index: {}]  }
   0x1   :  { %v1463_v0 = vld [vmem:[%s2046_s1] sm:$0xff]   ;;  %v1466_v3 = vld [vmem:[%s2047_s0 + $0x8] sm:$0xff]   ;;  %v1468_v5 = vld [vmem:[%s2047_s0 + $0x10] sm:$0xff]  }
   0x2   :  { %v1464_v1 = vld [vmem:[%s2047_s0] sm:$0xff]   ;;  %1395 = vmatprep.subr.bf16.mxu0 %v1463_v0  ;;  %1461 = vmatprep.subr.bf16.mxu1 %v1463_v0  ;;  %v1467_v4 = vld [vmem:[%s2047_s0 + $0x88] sm:$0xff]   ;;  %v1469_v6 = vld [vmem:[%s2047_s0 + $0x90] sm:$0xff]  }
   0x3   :  { %v1465_v2 = vld [vmem:[%s2047_s0 + $0x80] sm:$0xff]   ;;  %1396 = vmatpush3.bf16.msra.mxu0 %v1463_v0  ;;  %1462 = vmatpush3.bf16.msra.mxu1 %v1463_v0  ;;  %v1470_v7 = vld [vmem:[%s2047_s0 + $0x18] sm:$0xff]   ;;  %v1474_v11 = vld [vmem:[%s2047_s0 + $0x28] sm:$0xff]  }
   0x4   :  { %1397 = vmatprep.mubr.msk.bf16.mxu0 %vm250_vm0, %v1464_v1  ;;  %1429 = vmatprep.mubr.msk.bf16.mxu1 %vm250_vm0, %v1465_v2  ;;  %v1471_v8 = vld [vmem:[%s2047_s0 + $0x98] sm:$0xff]   ;;  %v1472_v9 = vld [vmem:[%s2047_s0 + $0x20] sm:$0xff]   ;;  %v1475_v12 = vld [vmem:[%s2047_s0 + $0xa8] sm:$0xff]  }
   0x5   :  { %v1473_v10 = vld [vmem:[%s2047_s0 + $0xa0] sm:$0xff]   ;;  %v1476_v13 = vld [vmem:[%s2047_s0 + $0x30] sm:$0xff]   ;;  %v1478_v15 = vld [vmem:[%s2047_s0 + $0x38] sm:$0xff]  }
   0x6   :  { %1398 = vmatmul.mubr.msk.bf16.vlgmr.msra.gmra.mrb[0].mxu0 %vm250_vm0, %v1466_v3  ;;  %1430 = vmatmul.mubr.msk.bf16.vlgmr.msra.gmra.mrb[0].mxu1 %vm250_vm0, %v1467_v4  ;;  %v1477_v14 = vld [vmem:[%s2047_s0 + $0xb0] sm:$0xff]   ;;  %v1479_v16 = vld [vmem:[%s2047_s0 + $0xb8] sm:$0xff]   ;;  %v1480_v17 = vld [vmem:[%s2047_s0 + $0x40] sm:$0xff]  }
   0x7   :  { %1401 = vmatprep.mubr.msk.bf16.mxu0 %vm250_vm0, %v1468_v5  ;;  %1433 = vmatprep.mubr.msk.bf16.mxu1 %vm250_vm0, %v1469_v6  ;;  %v1481_v18 = vld [vmem:[%s2047_s0 + $0xc0] sm:$0xff]   ;;  %v1482_v19 = vld [vmem:[%s2047_s0 + $0x48] sm:$0xff]   ;;  %v1484_v21 = vld [vmem:[%s2047_s0 + $0x50] sm:$0xff]  }
   0x8   :  { %v1483_v20 = vld [vmem:[%s2047_s0 + $0xc8] sm:$0xff]   ;;  %v1485_v22 = vld [vmem:[%s2047_s0 + $0xd0] sm:$0xff]   ;;  %v1486_v23 = vld [vmem:[%s2047_s0 + $0x58] sm:$0xff]  }
   0x9   :  { %v1487_v24 = vld [vmem:[%s2047_s0 + $0xd8] sm:$0xff]   ;;  %v1488_v25 = vld [vmem:[%s2047_s0 + $0x60] sm:$0xff]   ;;  %v1490_v27 = vld [vmem:[%s2047_s0 + $0x68] sm:$0xff]  }
   0xa   :  { %v1489_v26 = vld [vmem:[%s2047_s0 + $0xe0] sm:$0xff]   ;;  %v1491_v28 = vld [vmem:[%s2047_s0 + $0xe8] sm:$0xff]   ;;  %v1492_v29 = vld [vmem:[%s2047_s0 + $0x70] sm:$0xff]  }
   0xb   :  { %v1493_v30 = vld [vmem:[%s2047_s0 + $0xf0] sm:$0xff]   ;;  %v1494_v31 = vld [vmem:[%s2047_s0 + $0x78] sm:$0xff]   ;;  %v1655_v33 = vld [vmem:[%s2048_s2] ss:$0 sm:$0xff] }
   0xc   :  { %v1495_v32 = vld [vmem:[%s2047_s0 + $0xf8] sm:$0xff]   ;;  %v1660_v35 = vld [vmem:[%s2049_s3] ss:$0 sm:$0xff] }
   0xe   :  { %1402 = vmatmul.mubr.msk.bf16.gmra.mrb[4].mxu0 %vm250_vm0, %v1470_v7  ;;  %1434 = vmatmul.mubr.msk.bf16.gmra.mrb[4].mxu1 %vm250_vm0, %v1471_v8 }
   0xf   :  { %1405 = vmatprep.mubr.msk.bf16.mxu0 %vm250_vm0, %v1472_v9  ;;  %1437 = vmatprep.mubr.msk.bf16.mxu1 %vm250_vm0, %v1473_v10 }
  0x16   :  { %1406 = vmatmul.mubr.msk.bf16.gmra.mrb[8].mxu0 %vm250_vm0, %v1474_v11  ;;  %1438 = vmatmul.mubr.msk.bf16.gmra.mrb[8].mxu1 %vm250_vm0, %v1475_v12 }
  0x17   :  { %1409 = vmatprep.mubr.msk.bf16.mxu0 %vm250_vm0, %v1476_v13  ;;  %1441 = vmatprep.mubr.msk.bf16.mxu1 %vm250_vm0, %v1477_v14 }
  0x1e   :  { %1410 = vmatmul.mubr.msk.bf16.gmra.mrb[12].mxu0 %vm250_vm0, %v1478_v15  ;;  %1442 = vmatmul.mubr.msk.bf16.gmra.mrb[12].mxu1 %vm250_vm0, %v1479_v16 }
  0x1f   :  { %1413 = vmatprep.mubr.msk.bf16.mxu0 %vm250_vm0, %v1480_v17  ;;  %1445 = vmatprep.mubr.msk.bf16.mxu1 %vm250_vm0, %v1481_v18 }
  0x26   :  { %1414 = vmatmul.mubr.msk.bf16.gmra.mrb[16].mxu0 %vm250_vm0, %v1482_v19  ;;  %1446 = vmatmul.mubr.msk.bf16.gmra.mrb[16].mxu1 %vm250_vm0, %v1483_v20 }
  0x27   :  { %1417 = vmatprep.mubr.msk.bf16.mxu0 %vm250_vm0, %v1484_v21  ;;  %1449 = vmatprep.mubr.msk.bf16.mxu1 %vm250_vm0, %v1485_v22 }
  0x2e   :  { %1418 = vmatmul.mubr.msk.bf16.gmra.mrb[20].mxu0 %vm250_vm0, %v1486_v23  ;;  %1450 = vmatmul.mubr.msk.bf16.gmra.mrb[20].mxu1 %vm250_vm0, %v1487_v24 }
  0x2f   :  { %1421 = vmatprep.mubr.msk.bf16.mxu0 %vm250_vm0, %v1488_v25  ;;  %1453 = vmatprep.mubr.msk.bf16.mxu1 %vm250_vm0, %v1489_v26 }
  0x36   :  { %1422 = vmatmul.mubr.msk.bf16.gmra.mrb[24].mxu0 %vm250_vm0, %v1490_v27  ;;  %1454 = vmatmul.mubr.msk.bf16.gmra.mrb[24].mxu1 %vm250_vm0, %v1491_v28 }
  0x37   :  { %1425 = vmatprep.mubr.msk.bf16.mxu0 %vm250_vm0, %v1492_v29  ;;  %1457 = vmatprep.mubr.msk.bf16.mxu1 %vm250_vm0, %v1493_v30 }
  0x3e   :  { %1426 = vmatmul.mubr.msk.bf16.gmra.mrb[28].mxu0 %vm250_vm0, %v1494_v31  ;;  %1458 = vmatmul.mubr.msk.bf16.gmra.mrb[28].mxu1 %vm250_vm0, %v1495_v32 }
  0xd9   :  { %v1399_v34 = vpop.f32.mrb[0].mxu0  ;;  %v1431_v36 = vpop.f32.mrb[0].mxu1 }
  0xda   :  { %v645_v37 = vmul.f32 %v1399_v34, %v1655_v33  ;;  %v677_v38 = vmul.f32 %v1431_v36, %v1655_v33  ;;  %v381_v39 = vpop.f32.mrb[1].mxu0  ;;  %v509_v40 = vpop.f32.mrb[1].mxu1 }
  0xdb   :  { %v643_v41 = vmul.f32 %v1655_v33, %v381_v39  ;;  %v675_v42 = vmul.f32 %v1655_v33, %v509_v40  ;;  %v1400_v43 = vpop.f32.mrb[2].mxu0  ;;  %v1432_v44 = vpop.f32.mrb[2].mxu1 }
  0xdc   :  { %v716_v45 = vadd.f32 %v1660_v35, %v645_v37  ;;  %v748_v46 = vadd.f32 %v1660_v35, %v677_v38  ;;  %v646_v47 = vmul.f32 %v1400_v43, %v1655_v33  ;;  %v678_v48 = vmul.f32 %v1432_v44, %v1655_v33  ;;  %v384_v49 = vpop.f32.mrb[3].mxu0  ;;  %v512_v50 = vpop.f32.mrb[3].mxu1 }
  0xdd   :  { %v714_v51 = vadd.f32 %v1660_v35, %v643_v41  ;;  %v746_v52 = vadd.f32 %v1660_v35, %v675_v42  ;;  %v644_v53 = vmul.f32 %v1655_v33, %v384_v49  ;;  %v676_v54 = vmul.f32 %v1655_v33, %v512_v50 }
  0xde   :  { %v780_v55 = vmax.f32 %v716_v45, 0.0  ;;  %v812_v56 = vmax.f32 %v748_v46, 0.0  ;;  %v717_v57 = vadd.f32 %v1660_v35, %v646_v47  ;;  %v749_v58 = vadd.f32 %v1660_v35, %v678_v48 }
  0xdf   :  { %v778_v59 = vmax.f32 %v714_v51, 0.0  ;;  %v810_v60 = vmax.f32 %v746_v52, 0.0  ;;  %v715_v61 = vadd.f32 %v1660_v35, %v644_v53  ;;  %v747_v62 = vadd.f32 %v1660_v35, %v676_v54 }
  0xe0   :  { %v1300_v63 = vpack.c.bf16 %v780_v55, %v780_v55  ;;  %v1332_v0 = vpack.c.bf16 %v812_v56, %v812_v56  ;;  %v781_v1 = vmax.f32 %v717_v57, 0.0  ;;  %v813_v2 = vmax.f32 %v749_v58, 0.0 }
  0xe1   :  { %v1298_v3 = vpack.c.bf16 %v778_v59, %v778_v59  ;;  %v1330_v4 = vpack.c.bf16 %v810_v60, %v810_v60  ;;  %v779_v5 = vmax.f32 %v715_v61, 0.0  ;;  %v811_v6 = vmax.f32 %v747_v62, 0.0  ;;  %v1403_v7 = vpop.f32.mrb[4].mxu0  ;;  %v1435_v8 = vpop.f32.mrb[4].mxu1 }
  0xe2   :  { %1101 = vst.msk [vmem:[%s2050_s4 + $0x8] sm:$0xf] %vm1098_vm1, %v1300_v63  ;;  %1133 = vst.msk [vmem:[%s2050_s4 + $0x88] sm:$0xf] %vm1098_vm1, %v1332_v0  ;;  %v1301_v9 = vpack.c.bf16 %v781_v1, %v781_v1  ;;  %v1333_v10 = vpack.c.bf16 %v813_v2, %v813_v2  ;;  %v649_v11 = vmul.f32 %v1403_v7, %v1655_v33  ;;  %v397_v13 = vpop.f32.mrb[5].mxu0  ;;  %v525_v14 = vpop.f32.mrb[5].mxu1 }
  0xe3   :  { %v681_v12 = vmul.f32 %v1435_v8, %v1655_v33  ;;  %1099 = vst.msk [vmem:[%s2050_s4] sm:$0xf] %vm1098_vm1, %v1298_v3  ;;  %1131 = vst.msk [vmem:[%s2050_s4 + $0x80] sm:$0xf] %vm1098_vm1, %v1330_v4  ;;  %v1299_v15 = vpack.c.bf16 %v779_v5, %v779_v5  ;;  %v1331_v16 = vpack.c.bf16 %v811_v6, %v811_v6  ;;  %v1404_v19 = vpop.f32.mrb[6].mxu0  ;;  %v1436_v20 = vpop.f32.mrb[6].mxu1 }
  0xe4   :  { %v647_v17 = vmul.f32 %v1655_v33, %v397_v13  ;;  %v679_v18 = vmul.f32 %v1655_v33, %v525_v14  ;;  %1102 = vst.msk [vmem:[%s2050_s4 + $0xc] sm:$0xf] %vm1098_vm1, %v1301_v9  ;;  %1134 = vst.msk [vmem:[%s2050_s4 + $0x8c] sm:$0xf] %vm1098_vm1, %v1333_v10  ;;  %v720_v21 = vadd.f32 %v1660_v35, %v649_v11  ;;  %v400_v25 = vpop.f32.mrb[7].mxu0  ;;  %v528_v26 = vpop.f32.mrb[7].mxu1 }
  0xe5   :  { %v752_v22 = vadd.f32 %v1660_v35, %v681_v12  ;;  %v650_v23 = vmul.f32 %v1404_v19, %v1655_v33  ;;  %v682_v24 = vmul.f32 %v1436_v20, %v1655_v33  ;;  %1100 = vst.msk [vmem:[%s2050_s4 + $0x4] sm:$0xf] %vm1098_vm1, %v1299_v15  ;;  %1132 = vst.msk [vmem:[%s2050_s4 + $0x84] sm:$0xf] %vm1098_vm1, %v1331_v16 }
  0xe6   :  { %v718_v27 = vadd.f32 %v1660_v35, %v647_v17  ;;  %v750_v28 = vadd.f32 %v1660_v35, %v679_v18  ;;  %v648_v29 = vmul.f32 %v1655_v33, %v400_v25  ;;  %v680_v30 = vmul.f32 %v1655_v33, %v528_v26 }
  0xe7   :  { %v784_v31 = vmax.f32 %v720_v21, 0.0  ;;  %v816_v32 = vmax.f32 %v752_v22, 0.0  ;;  %v721_v34 = vadd.f32 %v1660_v35, %v650_v23  ;;  %v753_v36 = vadd.f32 %v1660_v35, %v682_v24 }
  0xe8   :  { %v782_v37 = vmax.f32 %v718_v27, 0.0  ;;  %v814_v38 = vmax.f32 %v750_v28, 0.0  ;;  %v719_v39 = vadd.f32 %v1660_v35, %v648_v29  ;;  %v751_v40 = vadd.f32 %v1660_v35, %v680_v30 }
  0xe9   :  { %v1304_v41 = vpack.c.bf16 %v784_v31, %v784_v31  ;;  %v1336_v42 = vpack.c.bf16 %v816_v32, %v816_v32  ;;  %v785_v43 = vmax.f32 %v721_v34, 0.0  ;;  %v817_v44 = vmax.f32 %v753_v36, 0.0  ;;  %v1407_v49 = vpop.f32.mrb[8].mxu0  ;;  %v1439_v50 = vpop.f32.mrb[8].mxu1 }
  0xea   :  { %v1302_v45 = vpack.c.bf16 %v782_v37, %v782_v37  ;;  %v1334_v46 = vpack.c.bf16 %v814_v38, %v814_v38  ;;  %v783_v47 = vmax.f32 %v719_v39, 0.0  ;;  %v815_v48 = vmax.f32 %v751_v40, 0.0  ;;  %v413_v55 = vpop.f32.mrb[9].mxu0  ;;  %v541_v56 = vpop.f32.mrb[9].mxu1 }
  0xeb   :  { %1105 = vst.msk [vmem:[%s2050_s4 + $0x18] sm:$0xf] %vm1098_vm1, %v1304_v41  ;;  %1137 = vst.msk [vmem:[%s2050_s4 + $0x98] sm:$0xf] %vm1098_vm1, %v1336_v42  ;;  %v1305_v51 = vpack.c.bf16 %v785_v43, %v785_v43  ;;  %v1337_v52 = vpack.c.bf16 %v817_v44, %v817_v44  ;;  %v653_v53 = vmul.f32 %v1407_v49, %v1655_v33  ;;  %v1408_v61 = vpop.f32.mrb[10].mxu0  ;;  %v1440_v62 = vpop.f32.mrb[10].mxu1 }
  0xec   :  { %v685_v54 = vmul.f32 %v1439_v50, %v1655_v33  ;;  %1103 = vst.msk [vmem:[%s2050_s4 + $0x10] sm:$0xf] %vm1098_vm1, %v1302_v45  ;;  %1135 = vst.msk [vmem:[%s2050_s4 + $0x90] sm:$0xf] %vm1098_vm1, %v1334_v46  ;;  %v1303_v57 = vpack.c.bf16 %v783_v47, %v783_v47  ;;  %v1335_v58 = vpack.c.bf16 %v815_v48, %v815_v48  ;;  %v416_v3 = vpop.f32.mrb[11].mxu0  ;;  %v544_v4 = vpop.f32.mrb[11].mxu1 }
  0xed   :  { %v651_v59 = vmul.f32 %v1655_v33, %v413_v55  ;;  %v683_v60 = vmul.f32 %v1655_v33, %v541_v56  ;;  %1106 = vst.msk [vmem:[%s2050_s4 + $0x1c] sm:$0xf] %vm1098_vm1, %v1305_v51  ;;  %1138 = vst.msk [vmem:[%s2050_s4 + $0x9c] sm:$0xf] %vm1098_vm1, %v1337_v52  ;;  %v724_v63 = vadd.f32 %v1660_v35, %v653_v53 }
  0xee   :  { %v756_v0 = vadd.f32 %v1660_v35, %v685_v54  ;;  %v654_v1 = vmul.f32 %v1408_v61, %v1655_v33  ;;  %v686_v2 = vmul.f32 %v1440_v62, %v1655_v33  ;;  %1104 = vst.msk [vmem:[%s2050_s4 + $0x14] sm:$0xf] %vm1098_vm1, %v1303_v57  ;;  %1136 = vst.msk [vmem:[%s2050_s4 + $0x94] sm:$0xf] %vm1098_vm1, %v1335_v58 }
  0xef   :  { %v722_v5 = vadd.f32 %v1660_v35, %v651_v59  ;;  %v754_v6 = vadd.f32 %v1660_v35, %v683_v60  ;;  %v652_v7 = vmul.f32 %v1655_v33, %v416_v3  ;;  %v684_v8 = vmul.f32 %v1655_v33, %v544_v4 }
  0xf0   :  { %v788_v9 = vmax.f32 %v724_v63, 0.0  ;;  %v820_v10 = vmax.f32 %v756_v0, 0.0  ;;  %v725_v11 = vadd.f32 %v1660_v35, %v654_v1  ;;  %v757_v12 = vadd.f32 %v1660_v35, %v686_v2 }
  0xf1   :  { %v786_v13 = vmax.f32 %v722_v5, 0.0  ;;  %v818_v14 = vmax.f32 %v754_v6, 0.0  ;;  %v723_v15 = vadd.f32 %v1660_v35, %v652_v7  ;;  %v755_v16 = vadd.f32 %v1660_v35, %v684_v8  ;;  %v1411_v25 = vpop.f32.mrb[12].mxu0  ;;  %v1443_v26 = vpop.f32.mrb[12].mxu1 }
  0xf2   :  { %v1308_v17 = vpack.c.bf16 %v788_v9, %v788_v9  ;;  %v1340_v18 = vpack.c.bf16 %v820_v10, %v820_v10  ;;  %v789_v19 = vmax.f32 %v725_v11, 0.0  ;;  %v821_v20 = vmax.f32 %v757_v12, 0.0  ;;  %v429_v31 = vpop.f32.mrb[13].mxu0  ;;  %v557_v32 = vpop.f32.mrb[13].mxu1 }
  0xf3   :  { %v1306_v21 = vpack.c.bf16 %v786_v13, %v786_v13  ;;  %v1338_v22 = vpack.c.bf16 %v818_v14, %v818_v14  ;;  %v787_v23 = vmax.f32 %v723_v15, 0.0  ;;  %v819_v24 = vmax.f32 %v755_v16, 0.0  ;;  %v1412_v39 = vpop.f32.mrb[14].mxu0  ;;  %v1444_v40 = vpop.f32.mrb[14].mxu1 }
  0xf4   :  { %1109 = vst.msk [vmem:[%s2050_s4 + $0x28] sm:$0xf] %vm1098_vm1, %v1308_v17  ;;  %1141 = vst.msk [vmem:[%s2050_s4 + $0xa8] sm:$0xf] %vm1098_vm1, %v1340_v18  ;;  %v1309_v27 = vpack.c.bf16 %v789_v19, %v789_v19  ;;  %v1341_v28 = vpack.c.bf16 %v821_v20, %v821_v20  ;;  %v657_v29 = vmul.f32 %v1411_v25, %v1655_v33  ;;  %v432_v45 = vpop.f32.mrb[15].mxu0  ;;  %v560_v46 = vpop.f32.mrb[15].mxu1 }
  0xf5   :  { %v689_v30 = vmul.f32 %v1443_v26, %v1655_v33  ;;  %1107 = vst.msk [vmem:[%s2050_s4 + $0x20] sm:$0xf] %vm1098_vm1, %v1306_v21  ;;  %1139 = vst.msk [vmem:[%s2050_s4 + $0xa0] sm:$0xf] %vm1098_vm1, %v1338_v22  ;;  %v1307_v34 = vpack.c.bf16 %v787_v23, %v787_v23  ;;  %v1339_v36 = vpack.c.bf16 %v819_v24, %v819_v24 }
  0xf6   :  { %v655_v37 = vmul.f32 %v1655_v33, %v429_v31  ;;  %v687_v38 = vmul.f32 %v1655_v33, %v557_v32  ;;  %1110 = vst.msk [vmem:[%s2050_s4 + $0x2c] sm:$0xf] %vm1098_vm1, %v1309_v27  ;;  %1142 = vst.msk [vmem:[%s2050_s4 + $0xac] sm:$0xf] %vm1098_vm1, %v1341_v28  ;;  %v728_v41 = vadd.f32 %v1660_v35, %v657_v29 }
  0xf7   :  { %v760_v42 = vadd.f32 %v1660_v35, %v689_v30  ;;  %v658_v43 = vmul.f32 %v1412_v39, %v1655_v33  ;;  %v690_v44 = vmul.f32 %v1444_v40, %v1655_v33  ;;  %1108 = vst.msk [vmem:[%s2050_s4 + $0x24] sm:$0xf] %vm1098_vm1, %v1307_v34  ;;  %1140 = vst.msk [vmem:[%s2050_s4 + $0xa4] sm:$0xf] %vm1098_vm1, %v1339_v36 }
  0xf8   :  { %v726_v47 = vadd.f32 %v1660_v35, %v655_v37  ;;  %v758_v48 = vadd.f32 %v1660_v35, %v687_v38  ;;  %v656_v49 = vmul.f32 %v1655_v33, %v432_v45  ;;  %v688_v50 = vmul.f32 %v1655_v33, %v560_v46 }
  0xf9   :  { %v792_v51 = vmax.f32 %v728_v41, 0.0  ;;  %v824_v52 = vmax.f32 %v760_v42, 0.0  ;;  %v729_v53 = vadd.f32 %v1660_v35, %v658_v43  ;;  %v761_v54 = vadd.f32 %v1660_v35, %v690_v44  ;;  %v1415_v3 = vpop.f32.mrb[16].mxu0  ;;  %v1447_v4 = vpop.f32.mrb[16].mxu1 }
  0xfa   :  { %v790_v55 = vmax.f32 %v726_v47, 0.0  ;;  %v822_v56 = vmax.f32 %v758_v48, 0.0  ;;  %v727_v57 = vadd.f32 %v1660_v35, %v656_v49  ;;  %v759_v58 = vadd.f32 %v1660_v35, %v688_v50  ;;  %v445_v9 = vpop.f32.mrb[17].mxu0  ;;  %v573_v10 = vpop.f32.mrb[17].mxu1 }
  0xfb   :  { %v1312_v59 = vpack.c.bf16 %v792_v51, %v792_v51  ;;  %v1344_v60 = vpack.c.bf16 %v824_v52, %v824_v52  ;;  %v793_v61 = vmax.f32 %v729_v53, 0.0  ;;  %v825_v62 = vmax.f32 %v761_v54, 0.0  ;;  %v1416_v15 = vpop.f32.mrb[18].mxu0  ;;  %v1448_v16 = vpop.f32.mrb[18].mxu1 }
  0xfc   :  { %v1310_v63 = vpack.c.bf16 %v790_v55, %v790_v55  ;;  %v1342_v0 = vpack.c.bf16 %v822_v56, %v822_v56  ;;  %v791_v1 = vmax.f32 %v727_v57, 0.0  ;;  %v823_v2 = vmax.f32 %v759_v58, 0.0  ;;  %v448_v21 = vpop.f32.mrb[19].mxu0  ;;  %v576_v22 = vpop.f32.mrb[19].mxu1 }
  0xfd   :  { %1113 = vst.msk [vmem:[%s2050_s4 + $0x38] sm:$0xf] %vm1098_vm1, %v1312_v59  ;;  %1145 = vst.msk [vmem:[%s2050_s4 + $0xb8] sm:$0xf] %vm1098_vm1, %v1344_v60  ;;  %v1313_v5 = vpack.c.bf16 %v793_v61, %v793_v61  ;;  %v1345_v6 = vpack.c.bf16 %v825_v62, %v825_v62  ;;  %v661_v7 = vmul.f32 %v1415_v3, %v1655_v33 }
  0xfe   :  { %v693_v8 = vmul.f32 %v1447_v4, %v1655_v33  ;;  %1111 = vst.msk [vmem:[%s2050_s4 + $0x30] sm:$0xf] %vm1098_vm1, %v1310_v63  ;;  %1143 = vst.msk [vmem:[%s2050_s4 + $0xb0] sm:$0xf] %vm1098_vm1, %v1342_v0  ;;  %v1311_v11 = vpack.c.bf16 %v791_v1, %v791_v1  ;;  %v1343_v12 = vpack.c.bf16 %v823_v2, %v823_v2 }
  0xff   :  { %v659_v13 = vmul.f32 %v1655_v33, %v445_v9  ;;  %v691_v14 = vmul.f32 %v1655_v33, %v573_v10  ;;  %1114 = vst.msk [vmem:[%s2050_s4 + $0x3c] sm:$0xf] %vm1098_vm1, %v1313_v5  ;;  %1146 = vst.msk [vmem:[%s2050_s4 + $0xbc] sm:$0xf] %vm1098_vm1, %v1345_v6  ;;  %v732_v17 = vadd.f32 %v1660_v35, %v661_v7 }
 0x100   :  { %v764_v18 = vadd.f32 %v1660_v35, %v693_v8  ;;  %v662_v19 = vmul.f32 %v1416_v15, %v1655_v33  ;;  %v694_v20 = vmul.f32 %v1448_v16, %v1655_v33  ;;  %1112 = vst.msk [vmem:[%s2050_s4 + $0x34] sm:$0xf] %vm1098_vm1, %v1311_v11  ;;  %1144 = vst.msk [vmem:[%s2050_s4 + $0xb4] sm:$0xf] %vm1098_vm1, %v1343_v12 }
 0x101   :  { %v730_v23 = vadd.f32 %v1660_v35, %v659_v13  ;;  %v762_v24 = vadd.f32 %v1660_v35, %v691_v14  ;;  %v660_v25 = vmul.f32 %v1655_v33, %v448_v21  ;;  %v692_v26 = vmul.f32 %v1655_v33, %v576_v22  ;;  %v1419_v45 = vpop.f32.mrb[20].mxu0  ;;  %v1451_v46 = vpop.f32.mrb[20].mxu1 }
 0x102   :  { %v796_v27 = vmax.f32 %v732_v17, 0.0  ;;  %v828_v28 = vmax.f32 %v764_v18, 0.0  ;;  %v733_v29 = vadd.f32 %v1660_v35, %v662_v19  ;;  %v765_v30 = vadd.f32 %v1660_v35, %v694_v20  ;;  %v461_v51 = vpop.f32.mrb[21].mxu0  ;;  %v589_v52 = vpop.f32.mrb[21].mxu1 }
 0x103   :  { %v794_v31 = vmax.f32 %v730_v23, 0.0  ;;  %v826_v32 = vmax.f32 %v762_v24, 0.0  ;;  %v731_v34 = vadd.f32 %v1660_v35, %v660_v25  ;;  %v763_v36 = vadd.f32 %v1660_v35, %v692_v26  ;;  %v1420_v57 = vpop.f32.mrb[22].mxu0  ;;  %v1452_v58 = vpop.f32.mrb[22].mxu1 }
 0x104   :  { %v1316_v37 = vpack.c.bf16 %v796_v27, %v796_v27  ;;  %v1348_v38 = vpack.c.bf16 %v828_v28, %v828_v28  ;;  %v797_v39 = vmax.f32 %v733_v29, 0.0  ;;  %v829_v40 = vmax.f32 %v765_v30, 0.0  ;;  %v464_v63 = vpop.f32.mrb[23].mxu0  ;;  %v592_v0 = vpop.f32.mrb[23].mxu1 }
 0x105   :  { %v1314_v41 = vpack.c.bf16 %v794_v31, %v794_v31  ;;  %v1346_v42 = vpack.c.bf16 %v826_v32, %v826_v32  ;;  %v795_v43 = vmax.f32 %v731_v34, 0.0  ;;  %v827_v44 = vmax.f32 %v763_v36, 0.0 }
 0x106   :  { %1117 = vst.msk [vmem:[%s2050_s4 + $0x48] sm:$0xf] %vm1098_vm1, %v1316_v37  ;;  %1149 = vst.msk [vmem:[%s2050_s4 + $0xc8] sm:$0xf] %vm1098_vm1, %v1348_v38  ;;  %v1317_v47 = vpack.c.bf16 %v797_v39, %v797_v39  ;;  %v1349_v48 = vpack.c.bf16 %v829_v40, %v829_v40  ;;  %v665_v49 = vmul.f32 %v1419_v45, %v1655_v33 }
 0x107   :  { %v697_v50 = vmul.f32 %v1451_v46, %v1655_v33  ;;  %1115 = vst.msk [vmem:[%s2050_s4 + $0x40] sm:$0xf] %vm1098_vm1, %v1314_v41  ;;  %1147 = vst.msk [vmem:[%s2050_s4 + $0xc0] sm:$0xf] %vm1098_vm1, %v1346_v42  ;;  %v1315_v53 = vpack.c.bf16 %v795_v43, %v795_v43  ;;  %v1347_v54 = vpack.c.bf16 %v827_v44, %v827_v44 }
 0x108   :  { %v663_v55 = vmul.f32 %v1655_v33, %v461_v51  ;;  %v695_v56 = vmul.f32 %v1655_v33, %v589_v52  ;;  %1118 = vst.msk [vmem:[%s2050_s4 + $0x4c] sm:$0xf] %vm1098_vm1, %v1317_v47  ;;  %1150 = vst.msk [vmem:[%s2050_s4 + $0xcc] sm:$0xf] %vm1098_vm1, %v1349_v48  ;;  %v736_v59 = vadd.f32 %v1660_v35, %v665_v49 }
 0x109   :  { %v768_v60 = vadd.f32 %v1660_v35, %v697_v50  ;;  %v666_v61 = vmul.f32 %v1420_v57, %v1655_v33  ;;  %v698_v62 = vmul.f32 %v1452_v58, %v1655_v33  ;;  %1116 = vst.msk [vmem:[%s2050_s4 + $0x44] sm:$0xf] %vm1098_vm1, %v1315_v53  ;;  %1148 = vst.msk [vmem:[%s2050_s4 + $0xc4] sm:$0xf] %vm1098_vm1, %v1347_v54  ;;  %v1423_v21 = vpop.f32.mrb[24].mxu0  ;;  %v1455_v22 = vpop.f32.mrb[24].mxu1 }
 0x10a   :  { %v734_v1 = vadd.f32 %v1660_v35, %v663_v55  ;;  %v766_v2 = vadd.f32 %v1660_v35, %v695_v56  ;;  %v664_v3 = vmul.f32 %v1655_v33, %v464_v63  ;;  %v696_v4 = vmul.f32 %v1655_v33, %v592_v0  ;;  %v477_v27 = vpop.f32.mrb[25].mxu0  ;;  %v605_v28 = vpop.f32.mrb[25].mxu1 }
 0x10b   :  { %v800_v5 = vmax.f32 %v736_v59, 0.0  ;;  %v832_v6 = vmax.f32 %v768_v60, 0.0  ;;  %v737_v7 = vadd.f32 %v1660_v35, %v666_v61  ;;  %v769_v8 = vadd.f32 %v1660_v35, %v698_v62  ;;  %v1424_v34 = vpop.f32.mrb[26].mxu0  ;;  %v1456_v36 = vpop.f32.mrb[26].mxu1 }
 0x10c   :  { %v798_v9 = vmax.f32 %v734_v1, 0.0  ;;  %v830_v10 = vmax.f32 %v766_v2, 0.0  ;;  %v735_v11 = vadd.f32 %v1660_v35, %v664_v3  ;;  %v767_v12 = vadd.f32 %v1660_v35, %v696_v4  ;;  %v480_v41 = vpop.f32.mrb[27].mxu0  ;;  %v608_v42 = vpop.f32.mrb[27].mxu1 }
 0x10d   :  { %v1320_v13 = vpack.c.bf16 %v800_v5, %v800_v5  ;;  %v1352_v14 = vpack.c.bf16 %v832_v6, %v832_v6  ;;  %v801_v15 = vmax.f32 %v737_v7, 0.0  ;;  %v833_v16 = vmax.f32 %v769_v8, 0.0 }
 0x10e   :  { %v1318_v17 = vpack.c.bf16 %v798_v9, %v798_v9  ;;  %v1350_v18 = vpack.c.bf16 %v830_v10, %v830_v10  ;;  %v799_v19 = vmax.f32 %v735_v11, 0.0  ;;  %v831_v20 = vmax.f32 %v767_v12, 0.0 }
 0x10f   :  { %1121 = vst.msk [vmem:[%s2050_s4 + $0x58] sm:$0xf] %vm1098_vm1, %v1320_v13  ;;  %1153 = vst.msk [vmem:[%s2050_s4 + $0xd8] sm:$0xf] %vm1098_vm1, %v1352_v14  ;;  %v1321_v23 = vpack.c.bf16 %v801_v15, %v801_v15  ;;  %v1353_v24 = vpack.c.bf16 %v833_v16, %v833_v16  ;;  %v669_v25 = vmul.f32 %v1423_v21, %v1655_v33 }
 0x110   :  { %v701_v26 = vmul.f32 %v1455_v22, %v1655_v33  ;;  %1119 = vst.msk [vmem:[%s2050_s4 + $0x50] sm:$0xf] %vm1098_vm1, %v1318_v17  ;;  %1151 = vst.msk [vmem:[%s2050_s4 + $0xd0] sm:$0xf] %vm1098_vm1, %v1350_v18  ;;  %v1319_v29 = vpack.c.bf16 %v799_v19, %v799_v19  ;;  %v1351_v30 = vpack.c.bf16 %v831_v20, %v831_v20 }
 0x111   :  { %v667_v31 = vmul.f32 %v1655_v33, %v477_v27  ;;  %v699_v32 = vmul.f32 %v1655_v33, %v605_v28  ;;  %1122 = vst.msk [vmem:[%s2050_s4 + $0x5c] sm:$0xf] %vm1098_vm1, %v1321_v23  ;;  %1154 = vst.msk [vmem:[%s2050_s4 + $0xdc] sm:$0xf] %vm1098_vm1, %v1353_v24  ;;  %v740_v37 = vadd.f32 %v1660_v35, %v669_v25  ;;  %v1427_v63 = vpop.f32.mrb[28].mxu0  ;;  %v1459_v0 = vpop.f32.mrb[28].mxu1 }
 0x112   :  { %v772_v38 = vadd.f32 %v1660_v35, %v701_v26  ;;  %v670_v39 = vmul.f32 %v1424_v34, %v1655_v33  ;;  %v702_v40 = vmul.f32 %v1456_v36, %v1655_v33  ;;  %1120 = vst.msk [vmem:[%s2050_s4 + $0x54] sm:$0xf] %vm1098_vm1, %v1319_v29  ;;  %1152 = vst.msk [vmem:[%s2050_s4 + $0xd4] sm:$0xf] %vm1098_vm1, %v1351_v30  ;;  %v493_v5 = vpop.f32.mrb[29].mxu0  ;;  %v621_v6 = vpop.f32.mrb[29].mxu1 }
 0x113   :  { %v738_v43 = vadd.f32 %v1660_v35, %v667_v31  ;;  %v770_v44 = vadd.f32 %v1660_v35, %v699_v32  ;;  %v668_v45 = vmul.f32 %v1655_v33, %v480_v41  ;;  %v700_v46 = vmul.f32 %v1655_v33, %v608_v42  ;;  %v1428_v11 = vpop.f32.mrb[30].mxu0  ;;  %v1460_v12 = vpop.f32.mrb[30].mxu1 }
 0x114   :  { %v804_v47 = vmax.f32 %v740_v37, 0.0  ;;  %v836_v48 = vmax.f32 %v772_v38, 0.0  ;;  %v741_v49 = vadd.f32 %v1660_v35, %v670_v39  ;;  %v773_v50 = vadd.f32 %v1660_v35, %v702_v40  ;;  %v496_v17 = vpop.f32.mrb[31].mxu0  ;;  %v624_v18 = vpop.f32.mrb[31].mxu1 }
 0x115   :  { %v802_v51 = vmax.f32 %v738_v43, 0.0  ;;  %v834_v52 = vmax.f32 %v770_v44, 0.0  ;;  %v739_v53 = vadd.f32 %v1660_v35, %v668_v45  ;;  %v771_v54 = vadd.f32 %v1660_v35, %v700_v46 }
 0x116   :  { %v1324_v55 = vpack.c.bf16 %v804_v47, %v804_v47  ;;  %v1356_v56 = vpack.c.bf16 %v836_v48, %v836_v48  ;;  %v805_v57 = vmax.f32 %v741_v49, 0.0  ;;  %v837_v58 = vmax.f32 %v773_v50, 0.0 }
 0x117   :  { %v1322_v59 = vpack.c.bf16 %v802_v51, %v802_v51  ;;  %v1354_v60 = vpack.c.bf16 %v834_v52, %v834_v52  ;;  %v803_v61 = vmax.f32 %v739_v53, 0.0  ;;  %v835_v62 = vmax.f32 %v771_v54, 0.0 }
 0x118   :  { %1125 = vst.msk [vmem:[%s2050_s4 + $0x68] sm:$0xf] %vm1098_vm1, %v1324_v55  ;;  %1157 = vst.msk [vmem:[%s2050_s4 + $0xe8] sm:$0xf] %vm1098_vm1, %v1356_v56  ;;  %v1325_v1 = vpack.c.bf16 %v805_v57, %v805_v57  ;;  %v1357_v2 = vpack.c.bf16 %v837_v58, %v837_v58  ;;  %v673_v3 = vmul.f32 %v1427_v63, %v1655_v33 }
 0x119   :  { %v705_v4 = vmul.f32 %v1459_v0, %v1655_v33  ;;  %1123 = vst.msk [vmem:[%s2050_s4 + $0x60] sm:$0xf] %vm1098_vm1, %v1322_v59  ;;  %1155 = vst.msk [vmem:[%s2050_s4 + $0xe0] sm:$0xf] %vm1098_vm1, %v1354_v60  ;;  %v1323_v7 = vpack.c.bf16 %v803_v61, %v803_v61  ;;  %v1355_v8 = vpack.c.bf16 %v835_v62, %v835_v62 }
 0x11a   :  { %v671_v9 = vmul.f32 %v1655_v33, %v493_v5  ;;  %v703_v10 = vmul.f32 %v1655_v33, %v621_v6  ;;  %1126 = vst.msk [vmem:[%s2050_s4 + $0x6c] sm:$0xf] %vm1098_vm1, %v1325_v1  ;;  %1158 = vst.msk [vmem:[%s2050_s4 + $0xec] sm:$0xf] %vm1098_vm1, %v1357_v2  ;;  %v744_v13 = vadd.f32 %v1660_v35, %v673_v3 }
 0x11b   :  { %v776_v14 = vadd.f32 %v1660_v35, %v705_v4  ;;  %v674_v15 = vmul.f32 %v1428_v11, %v1655_v33  ;;  %v706_v16 = vmul.f32 %v1460_v12, %v1655_v33  ;;  %1124 = vst.msk [vmem:[%s2050_s4 + $0x64] sm:$0xf] %vm1098_vm1, %v1323_v7  ;;  %1156 = vst.msk [vmem:[%s2050_s4 + $0xe4] sm:$0xf] %vm1098_vm1, %v1355_v8 }
 0x11c   :  { %v742_v19 = vadd.f32 %v1660_v35, %v671_v9  ;;  %v774_v20 = vadd.f32 %v1660_v35, %v703_v10  ;;  %v672_v21 = vmul.f32 %v1655_v33, %v496_v17  ;;  %v704_v22 = vmul.f32 %v1655_v33, %v624_v18 }
 0x11d   :  { %v808_v23 = vmax.f32 %v744_v13, 0.0  ;;  %v840_v24 = vmax.f32 %v776_v14, 0.0  ;;  %v745_v25 = vadd.f32 %v1660_v35, %v674_v15  ;;  %v777_v26 = vadd.f32 %v1660_v35, %v706_v16 }
 0x11e   :  { %v806_v27 = vmax.f32 %v742_v19, 0.0  ;;  %v838_v28 = vmax.f32 %v774_v20, 0.0  ;;  %v743_v29 = vadd.f32 %v1660_v35, %v672_v21  ;;  %v775_v30 = vadd.f32 %v1660_v35, %v704_v22 }
 0x11f   :  { %v1328_v31 = vpack.c.bf16 %v808_v23, %v808_v23  ;;  %v1360_v32 = vpack.c.bf16 %v840_v24, %v840_v24  ;;  %v809_v34 = vmax.f32 %v745_v25, 0.0  ;;  %v841_v36 = vmax.f32 %v777_v26, 0.0 }
 0x120   :  { %v1326_v37 = vpack.c.bf16 %v806_v27, %v806_v27  ;;  %v1358_v38 = vpack.c.bf16 %v838_v28, %v838_v28  ;;  %v807_v39 = vmax.f32 %v743_v29, 0.0  ;;  %v839_v33 = vmax.f32 %v775_v30, 0.0 }
 0x121   :  { %1129 = vst.msk [vmem:[%s2050_s4 + $0x78] sm:$0xf] %vm1098_vm1, %v1328_v31  ;;  %1161 = vst.msk [vmem:[%s2050_s4 + $0xf8] sm:$0xf] %vm1098_vm1, %v1360_v32  ;;  %v1329_v40 = vpack.c.bf16 %v809_v34, %v809_v34  ;;  %v1361_v35 = vpack.c.bf16 %v841_v36, %v841_v36 }
 0x122   :  { %1127 = vst.msk [vmem:[%s2050_s4 + $0x70] sm:$0xf] %vm1098_vm1, %v1326_v37  ;;  %1159 = vst.msk [vmem:[%s2050_s4 + $0xf0] sm:$0xf] %vm1098_vm1, %v1358_v38  ;;  %v1327_v41 = vpack.c.bf16 %v807_v39, %v807_v39  ;;  %v1359_v42 = vpack.c.bf16 %v839_v33, %v839_v33 }
 0x123   :  { %1130 = vst.msk [vmem:[%s2050_s4 + $0x7c] sm:$0xf] %vm1098_vm1, %v1329_v40  ;;  %1162 = vst.msk [vmem:[%s2050_s4 + $0xfc] sm:$0xf] %vm1098_vm1, %v1361_v35 }
 0x124   :  { %1128 = vst.msk [vmem:[%s2050_s4 + $0x74] sm:$0xf] %vm1098_vm1, %v1327_v41  ;;  %1160 = vst.msk [vmem:[%s2050_s4 + $0xf4] sm:$0xf] %vm1098_vm1, %v1359_v42 }

</bundles_post_ra>
